<compile_context>
chip_gen: v6e
topology: v6e:2x2x1
jax: 0.10.0
libtpu: 0.0.40
codegen_flags: <defaults>
</compile_context>

<pallas_src>
import functools

import jax
import jax.numpy as jnp
from jax.experimental import pallas as pl
from jax.experimental.pallas import tpu as pltpu


def _round_up(x: int, m: int) -> int:
    return (x + m - 1) // m * m


def _pad2(a, rows: int, cols: int):
    r, c = a.shape
    if r == rows and c == cols:
        return a
    return jnp.pad(a, ((0, rows - r), (0, cols - c)))


def _vmem_ceiling_bytes() -> int:
    """Generation-aware VMEM budget ceiling (leaves headroom for the compiler)."""
    cap = 0
    try:
        cap = int(pltpu.get_tpu_info().vmem_capacity_bytes)
    except Exception:
        cap = 0
    if cap <= 0:
        cap = 64 * 1024 * 1024          # conservative fallback: v7x physical VMEM
    return min(int(cap * 0.85), 112 * 1024 * 1024)


def _mlp_decoder_kernel(x_ref, w1_ref, b1_ref, w4_ref, b4_ref, o_ref, h_ref):
    """One (tm x tn) tile of the vocab projection.

    x:  (tm, K)   f32   resident across the vocab sweep (Buffered(1))
    w1: (K, K)    bf16  resident (Buffered(1))
    b1: (1, K)    f32   resident (Buffered(1))
    w4: (K, tn)   bf16  streamed per vocab tile (double-buffered)
    b4: (1, tn)   f32
    o:  (tm, tn)  f32
    h:  (tm, K)   bf16  VMEM scratch, persists across the vocab sweep
    """
    # First GEMM + ReLU only once per (core-slice, batch tile); h stays
    # resident, already in the dtype the second MXU pass consumes.
    @pl.when(pl.program_id(2) == 0)
    def _():
        x_lo = x_ref[...].astype(w1_ref.dtype)           # bf16 into the MXU
        h = jnp.dot(x_lo, w1_ref[...],
                    preferred_element_type=jnp.float32) + b1_ref[...]
        # TODO(synk): dropout is identity in eval mode; training-mode dropout
        # mask (pltpu.prng_*) not implemented.
        h_ref[...] = jnp.maximum(h, 0.0).astype(h_ref.dtype)     # F.relu

    # Vocab projection for this tile: bf16 MXU matmul, f32 accumulate.
    o_ref[...] = jnp.dot(h_ref[...], w4_ref[...],
                         preferred_element_type=jnp.float32) + b4_ref[...]


def make_mlp_decoder(w1, b1, w4, b4, *, block_n: int = 1024,
                     weight_dtype=jnp.bfloat16):
    """Prepare weights once; return a jitted forward(enc_output) closure.

    Weights are the nn.Linear parameters pre-transposed to (in, out):
      w1: (d_model, d_model),     b1: (1, d_model)
      w4: (d_model, n_tgt_vocab), b4: (1, n_tgt_vocab)
    NOTE: weights/activations feed the MXU in bf16 (f32 accumulation) — an
    intentional precision trade vs the f32 PyTorch module.
    """
    d_model = w1.shape[0]
    n_tgt_vocab = w4.shape[1]
    wbytes = jnp.dtype(weight_dtype).itemsize

    # ---- tiled geometry (chosen once) ---------------------------------------
    K_pad = _round_up(d_model, 128)                 # lane-dense contraction dim
    tm_max = 256                                    # batch-tile cap (1 W4 pass for B<=256)
    ceiling = _vmem_ceiling_bytes()

    tn = min(_round_up(block_n, 256), _round_up(n_tgt_vocab, 128))

    def _vmem_est(tm_, tn_):
        return (tm_ * K_pad * 4                     # x (single-buffered)
                + K_pad * K_pad * wbytes            # w1 (single-buffered)
                + K_pad * 4                         # b1 (single-buffered)
                + 2 * (K_pad * tn_ * wbytes         # w4 (double-buffered stream)
                       + tn_ * 4                    # b4
                       + tm_ * tn_ * 4)             # out
                + tm_ * K_pad * wbytes)             # resident h scratch (bf16)

    while tn > 256 and _vmem_est(tm_max, tn) > ceiling:
        tn -= 256                                   # shrink the W4 tile to fit VMEM

    # Split the vocab range across TensorCores: gives the second core on v7x
    # real work even when there is a single batch tile; harmless on v5e/v6e.
    nj_total = _round_up(n_tgt_vocab, tn) // tn
    csplit = 2 if nj_total >= 2 else 1
    N_pad = _round_up(n_tgt_vocab, csplit * tn)
    nj_per_core = N_pad // (csplit * tn)

    # ---- one-time weight prep (never re-done in the per-call path) ----------
    w1_p = _pad2(jnp.asarray(w1).astype(weight_dtype), K_pad, K_pad)
    b1_p = _pad2(jnp.asarray(b1).astype(jnp.float32), 1, K_pad)
    # TODO(synk): int8 weight-only quantization of W4 (per-channel scales) would
    # roughly halve the dominant HBM stream on v5e/v6e; not implemented.
    w4_p = _pad2(jnp.asarray(w4).astype(weight_dtype), K_pad, N_pad)
    b4_p = _pad2(jnp.asarray(b4).astype(jnp.float32), 1, N_pad)

    @jax.jit
    def _forward(enc_output, w1_p, b1_p, w4_p, b4_p):
        B = enc_output.shape[0]
        tm = min(_round_up(max(B, 1), 8), tm_max)    # >=8 f32 sublanes
        M_pad = _round_up(B, tm)
        grid = (csplit, M_pad // tm, nj_per_core)

        # enc_output.float(); zero padding contributes nothing to the GEMMs.
        x_p = _pad2(enc_output.astype(jnp.float32), M_pad, K_pad)

        vmem_limit = int(min(max(int(_vmem_est(tm, tn) * 1.25),
                                 32 * 1024 * 1024), ceiling))

        out_p = pl.pallas_call(
            _mlp_decoder_kernel,
            out_shape=jax.ShapeDtypeStruct((M_pad, N_pad), jnp.float32),
            grid=grid,
            in_specs=[
                # x / w1 / b1 are constant over the vocab sweep: single buffer.
                pl.BlockSpec((tm, K_pad), lambda c, i, j: (i, 0),
                             pipeline_mode=pl.Buffered(1)),
                pl.BlockSpec((K_pad, K_pad), lambda c, i, j: (0, 0),
                             pipeline_mode=pl.Buffered(1)),
                pl.BlockSpec((1, K_pad), lambda c, i, j: (0, 0),
                             pipeline_mode=pl.Buffered(1)),
                # W4 is the dominant HBM stream: default double-buffering
                # pipelines it across vocab tiles.
                pl.BlockSpec((K_pad, tn),
                             lambda c, i, j: (0, c * nj_per_core + j)),
                pl.BlockSpec((1, tn),
                             lambda c, i, j: (0, c * nj_per_core + j)),
            ],
            out_specs=pl.BlockSpec((tm, tn),
                                   lambda c, i, j: (i, c * nj_per_core + j)),
            scratch_shapes=[pltpu.VMEM((tm, K_pad), weight_dtype)],  # resident h
            compiler_params=pltpu.CompilerParams(
                # core-split and batch tiles are independent -> parallel
                # (megacore); the vocab sweep must be "arbitrary" so the h
                # scratch stays resident across it.
                dimension_semantics=("parallel", "parallel", "arbitrary"),
                vmem_limit_bytes=vmem_limit,
            ),
        )(x_p, w1_p, b1_p, w4_p, b4_p)

        # Strip padding, then .view(batch_size, 1, -1).
        dec = out_p[:B, :n_tgt_vocab]
        return (dec.reshape(B, 1, -1),)

    def forward(enc_output):
        return _forward(enc_output, w1_p, b1_p, w4_p, b4_p)

    return forward


if __name__ == "__main__":
    # Small, module-consistent shapes.
    B = 2              # batch
    d_model = 32       # d_model
    n_tgt_vocab = 16   # target vocab size

    key = jax.random.PRNGKey(0)
    k_x, k_w1, k_b1, k_w4, k_b4 = jax.random.split(key, 5)

    # enc_output (already reduced over the sequence by enc_transform='mean' upstream)
    enc_output = jax.random.normal(k_x, (B, d_model), dtype=jnp.float32)

    # Deterministic parameter init (nn.Linear-style uniform bounds).
    bound1 = 1.0 / (d_model ** 0.5)
    w1 = jax.random.uniform(k_w1, (d_model, d_model), jnp.float32, -bound1, bound1)
    b1 = jax.random.uniform(k_b1, (1, d_model), jnp.float32, -bound1, bound1)
    w4 = jax.random.uniform(k_w4, (d_model, n_tgt_vocab), jnp.float32, -bound1, bound1)
    b4 = jax.random.uniform(k_b4, (1, n_tgt_vocab), jnp.float32, -bound1, bound1)

    decoder = make_mlp_decoder(w1, b1, w4, b4)   # weight prep happens exactly once
    (dec,) = decoder(enc_output)
    jax.block_until_ready(dec)

    # Pure-JAX reference applying the same bf16 weight/activation quantization
    # the kernel feeds the MXU (f32 accumulation throughout).  NOTE: bf16
    # weights are a documented, intentional deviation from the f32 PyTorch module.
    x_q = enc_output.astype(jnp.bfloat16).astype(jnp.float32)
    w1_q = w1.astype(jnp.bfloat16).astype(jnp.float32)
    w4_q = w4.astype(jnp.bfloat16).astype(jnp.float32)
    h_ref = jnp.maximum(x_q @ w1_q + b1, 0.0)
    ref = (h_ref.astype(jnp.bfloat16).astype(jnp.float32) @ w4_q + b4).reshape(B, 1, -1)

    assert dec.shape == (B, 1, n_tgt_vocab), dec.shape
    assert jnp.allclose(dec, ref, atol=1e-4, rtol=1e-4), float(jnp.max(jnp.abs(dec - ref)))

    print("KERNEL_OK")
</pallas_src>

<mosaic_0001>
module attributes {stable_mosaic.version = 11 : i64} {
  func.func @_mlp_decoder_kernel(%arg0: i32, %arg1: i32, %arg2: i32, %arg3: memref<8x128xf32, #tpu.memory_space<vmem>>, %arg4: memref<128x128xbf16, #tpu.memory_space<vmem>>, %arg5: memref<1x128xf32, #tpu.memory_space<vmem>>, %arg6: memref<128x128xbf16, #tpu.memory_space<vmem>>, %arg7: memref<1x128xf32, #tpu.memory_space<vmem>>, %arg8: memref<8x128xf32, #tpu.memory_space<vmem>>, %arg9: memref<8x128xbf16, #tpu.memory_space<vmem>>) attributes {dimension_semantics = [#tpu.dimension_semantics<parallel>, #tpu.dimension_semantics<parallel>, #tpu.dimension_semantics<arbitrary>], iteration_bounds = array<i64: 1, 1, 1>, scalar_prefetch = 0 : i64, scratch_operands = 1 : i64, tpu.core_type = #tpu.core_type<tc>, window_params = [{pipeline_mode = #tpu.pipeline_mode<synchronous>, transform_indices = @transform_0, window_bounds = array<i64: 8, 128>}, {pipeline_mode = #tpu.pipeline_mode<synchronous>, transform_indices = @transform_1, window_bounds = array<i64: 128, 128>}, {pipeline_mode = #tpu.pipeline_mode<synchronous>, transform_indices = @transform_2, window_bounds = array<i64: 1, 128>}, {transform_indices = @transform_3, window_bounds = array<i64: 128, 128>}, {transform_indices = @transform_4, window_bounds = array<i64: 1, 128>}, {transform_indices = @transform_5, window_bounds = array<i64: 8, 128>}]} {
    %c0_i32 = arith.constant 0 : i32
    %0 = arith.cmpi eq, %arg2, %c0_i32 : i32
    %1 = arith.extui %0 : i1 to i32
    %c0_i32_0 = arith.constant 0 : i32
    %2 = arith.cmpi ne, %1, %c0_i32_0 : i32
    scf.if %2 {
      %c0_8 = arith.constant 0 : index
      %c0_9 = arith.constant 0 : index
      %10 = vector.load %arg3[%c0_8, %c0_9] : memref<8x128xf32, #tpu.memory_space<vmem>>, vector<8x128xf32>
      %11 = arith.truncf %10 : vector<8x128xf32> to vector<8x128xbf16>
      %c0_10 = arith.constant 0 : index
      %c0_11 = arith.constant 0 : index
      %12 = vector.load %arg4[%c0_10, %c0_11] : memref<128x128xbf16, #tpu.memory_space<vmem>>, vector<128x128xbf16>
      %cst_12 = arith.constant dense<0.000000e+00> : vector<8x128xf32>
      %13 = tpu.matmul %11, %12, %cst_12 {dimension_numbers = #tpu.dot_dimension_numbers<[1], [0], [0], [1], [0, 0, 1, 1], [], []>} : vector<8x128xbf16>, vector<128x128xbf16>, vector<8x128xf32> -> vector<8x128xf32>
      %c0_13 = arith.constant 0 : index
      %c0_14 = arith.constant 0 : index
      %14 = vector.load %arg5[%c0_13, %c0_14] : memref<1x128xf32, #tpu.memory_space<vmem>>, vector<1x128xf32>
      %15 = vector.broadcast %14 : vector<1x128xf32> to vector<8x128xf32>
      %16 = arith.addf %13, %15 : vector<8x128xf32>
      %cst_15 = arith.constant 0.000000e+00 : f32
      %17 = vector.broadcast %cst_15 : f32 to vector<8x128xf32>
      %18 = arith.maximumf %16, %17 : vector<8x128xf32>
      %19 = arith.truncf %18 : vector<8x128xf32> to vector<8x128xbf16>
      %c0_16 = arith.constant 0 : index
      %c0_17 = arith.constant 0 : index
      %20 = vector.load %arg9[%c0_16, %c0_17] : memref<8x128xbf16, #tpu.memory_space<vmem>>, vector<8x128xbf16>
      tpu.vector_store %arg9[%c0_16, %c0_17], %19 {strides = array<i32>} : memref<8x128xbf16, #tpu.memory_space<vmem>>, vector<8x128xbf16>,
    } else {
    }
    %c0 = arith.constant 0 : index
    %c0_1 = arith.constant 0 : index
    %3 = vector.load %arg9[%c0, %c0_1] : memref<8x128xbf16, #tpu.memory_space<vmem>>, vector<8x128xbf16>
    %c0_2 = arith.constant 0 : index
    %c0_3 = arith.constant 0 : index
    %4 = vector.load %arg6[%c0_2, %c0_3] : memref<128x128xbf16, #tpu.memory_space<vmem>>, vector<128x128xbf16>
    %cst = arith.constant dense<0.000000e+00> : vector<8x128xf32>
    %5 = tpu.matmul %3, %4, %cst {dimension_numbers = #tpu.dot_dimension_numbers<[1], [0], [0], [1], [0, 0, 1, 1], [], []>} : vector<8x128xbf16>, vector<128x128xbf16>, vector<8x128xf32> -> vector<8x128xf32>
    %c0_4 = arith.constant 0 : index
    %c0_5 = arith.constant 0 : index
    %6 = vector.load %arg7[%c0_4, %c0_5] : memref<1x128xf32, #tpu.memory_space<vmem>>, vector<1x128xf32>
    %7 = vector.broadcast %6 : vector<1x128xf32> to vector<8x128xf32>
    %8 = arith.addf %5, %7 : vector<8x128xf32>
    %c0_6 = arith.constant 0 : index
    %c0_7 = arith.constant 0 : index
    %9 = vector.load %arg8[%c0_6, %c0_7] : memref<8x128xf32, #tpu.memory_space<vmem>>, vector<8x128xf32>
    tpu.vector_store %arg8[%c0_6, %c0_7], %8 {strides = array<i32>} : memref<8x128xf32, #tpu.memory_space<vmem>>, vector<8x128xf32>,
    return
  }
  func.func @transform_0(%arg0: i32, %arg1: i32, %arg2: i32) -> (i32, i32) {
    %c0_i32 = arith.constant 0 : i32
    %c0_i32_0 = arith.constant 0 : i32
    return %arg1, %c0_i32 : i32, i32
  }
  func.func @transform_1(%arg0: i32, %arg1: i32, %arg2: i32) -> (i32, i32) {
    %c0_i32 = arith.constant 0 : i32
    %c0_i32_0 = arith.constant 0 : i32
    %c0_i32_1 = arith.constant 0 : i32
    return %c0_i32, %c0_i32_0 : i32, i32
  }
  func.func @transform_2(%arg0: i32, %arg1: i32, %arg2: i32) -> (i32, i32) {
    %c0_i32 = arith.constant 0 : i32
    %c0_i32_0 = arith.constant 0 : i32
    %c0_i32_1 = arith.constant 0 : i32
    return %c0_i32, %c0_i32_0 : i32, i32
  }
  func.func @transform_3(%arg0: i32, %arg1: i32, %arg2: i32) -> (i32, i32) {
    %c1_i32 = arith.constant 1 : i32
    %0 = arith.muli %arg0, %c1_i32 : i32
    %1 = arith.addi %0, %arg2 : i32
    %c0_i32 = arith.constant 0 : i32
    %c0_i32_0 = arith.constant 0 : i32
    return %c0_i32, %1 : i32, i32
  }
  func.func @transform_4(%arg0: i32, %arg1: i32, %arg2: i32) -> (i32, i32) {
    %c1_i32 = arith.constant 1 : i32
    %0 = arith.muli %arg0, %c1_i32 : i32
    %1 = arith.addi %0, %arg2 : i32
    %c0_i32 = arith.constant 0 : i32
    %c0_i32_0 = arith.constant 0 : i32
    return %c0_i32, %1 : i32, i32
  }
  func.func @transform_5(%arg0: i32, %arg1: i32, %arg2: i32) -> (i32, i32) {
    %c1_i32 = arith.constant 1 : i32
    %0 = arith.muli %arg0, %c1_i32 : i32
    %1 = arith.addi %0, %arg2 : i32
    %c0_i32 = arith.constant 0 : i32
    return %arg1, %1 : i32, i32
  }
}

</mosaic_0001>

<bundles_post_ra>
// kernel: _forward.1
= control target key start
LH: loop header
LB: loop body
LE: loop exit
PB: predicated region body
PF: predicated region fallthrough
CT: control target
= control target key end

     0   :  { %10 = vsyncpa [#allocation4], 0  ;;  %s535_s0 = inlined_call_operand.vmem [shape: f32[8,128], index: 0, kind: input, shape index: {}]   ;;  %s536_s1 = inlined_call_operand.hbm [shape: bf16[128,128], index: 1, kind: input, shape index: {}]   ;;  %s537_s2 = inlined_call_operand.vmem [shape: f32[1,128], index: 2, kind: input, shape index: {}]   ;;  %s538_s3 = inlined_call_operand.hbm [shape: bf16[128,128], index: 3, kind: input, shape index: {}]   ;;  %s539_s4 = inlined_call_operand.vmem [shape: f32[1,128], index: 4, kind: input, shape index: {}]   ;;  %s540_s5 = inlined_call_operand.vmem [shape: f32[8,128], index: 5, kind: output, shape index: {}]  }
   0x1   :  { %11 = vsyncpa [#allocation6], 0  ;;  %s481_s18 = smov [#allocation3]  }
   0x2   :  { %s19_s19 = sshll.u32 %s481_s18, 4  ;;  %s20_s19 = int_to_ptr.vmem [resolvable:$true] %s19_s19 }
   0x3   :  { %s445_s20 = scalar_lea.vmem %s20_s19, 1024  ;;  %p450_p1 = scmp.lt.s32.totalorder %s20_s19, %s20_s19 }
   0x4   :  { %p446_p0 = scmp.ne.s32.totalorder %s20_s19, %s445_s20  ;;  %p451_p2 = scmp.lt.s32.totalorder %s445_s20, %s445_s20 }
   0x6   :  { %p452_p3 = por %p451_p2, %p450_p1 }
   0x8   :  { %p453_p4 = pnand %p452_p3, %p446_p0 }
   0xa   :  { %456 = shalt.err (!%p453_p4)
}
   0xb   :  { %s482_s21 = smov 64   ;;  %s483_s22 = smov 4  }
   0xc   :  { %25 = dma.hbm_to_vmem [thread:$0]  %s536_s1, 1024, %s20_s19, [#allocation4], %s482_s21, %s482_s21, %s483_s22  }
   0xd   :  { %s484_s25 = smov [#allocation5]  }
   0xe   :  { %s36_s26 = sshll.u32 %s484_s25, 4  ;;  %s37_s26 = int_to_ptr.vmem [resolvable:$true] %s36_s26 }
   0xf   :  { %s465_s27 = scalar_lea.vmem %s37_s26, 1024  ;;  %p470_p6 = scmp.lt.s32.totalorder %s37_s26, %s37_s26 }
  0x10   :  { %p466_p5 = scmp.ne.s32.totalorder %s37_s26, %s465_s27  ;;  %p471_p7 = scmp.lt.s32.totalorder %s465_s27, %s465_s27 }
  0x12   :  { %p472_p8 = por %p471_p7, %p470_p6 }
  0x14   :  { %p473_p9 = pnand %p472_p8, %p466_p5 }
  0x16   :  { %476 = shalt.err (!%p473_p9)
}
  0x17   :  { %42 = dma.hbm_to_vmem [thread:$0]  %s538_s3, 1024, %s37_s26, [#allocation6], %s482_s21, %s482_s21, %s483_s22  }
  0x18   :  { %477 = dma.done.wait [#allocation4], 1024  }
  0x19   :  { %478 = vsyncadd [#allocation4], 4294966272 }
  0x1a   :  { %479 = dma.done.wait [#allocation6], 1024  }
  0x1b   :  { %480 = vsyncadd [#allocation6], 4294966272  ;;  %v485_v0 = vmov 0.0   ;;  %vm486_vm0 = vmmov 0   ;;  %v421_v1 = vld [vmem:[#allocation3 + $0x38] sm:$0xff]   ;;  %v422_v2 = vld [vmem:[#allocation3 + $0x30] sm:$0xff]  }
  0x1c   :  { %375 = vmatprep.subr.bf16.mxu0 %v485_v0  ;;  %391 = vmatprep.mubr.msk.bf16.mxu0 %vm486_vm0, %v485_v0  ;;  %v423_v3 = vld [vmem:[#allocation3 + $0x28] sm:$0xff]   ;;  %v429_v4 = vld [vmem:[#allocation5 + $0x38] sm:$0xff]   ;;  %v424_v5 = vld [vmem:[#allocation3 + $0x20] sm:$0xff]  }
  0x1d   :  { %395 = vmatprep.subr.bf16.mxu1 %v485_v0  ;;  %411 = vmatprep.mubr.msk.bf16.mxu1 %vm486_vm0, %v485_v0  ;;  %v430_v6 = vld [vmem:[#allocation5 + $0x30] sm:$0xff]   ;;  %v425_v7 = vld [vmem:[#allocation3 + $0x18] sm:$0xff]   ;;  %v431_v8 = vld [vmem:[#allocation5 + $0x28] sm:$0xff]  }
  0x1e   :  { %376 = vmatpush3.bf16.msra.mxu0 %v421_v1  ;;  %396 = vmatpush3.bf16.msra.mxu1 %v429_v4  ;;  %v426_v9 = vld [vmem:[#allocation3 + $0x10] sm:$0xff]   ;;  %v432_v10 = vld [vmem:[#allocation5 + $0x20] sm:$0xff]   ;;  %v427_v11 = vld [vmem:[#allocation3 + $0x8] sm:$0xff]  }
  0x1f   :  { %377 = vmatprep.subr.bf16.mxu0 %v485_v0  ;;  %397 = vmatprep.subr.bf16.mxu1 %v485_v0  ;;  %v428_v12 = vld [vmem:[#allocation3] sm:$0xff]   ;;  %v433_v15 = vld [vmem:[#allocation5 + $0x18] sm:$0xff]   ;;  %v434_v16 = vld [vmem:[#allocation5 + $0x10] sm:$0xff]  }
  0x20   :  { %v82_v13 = vld [vmem:[%s535_s0] sm:$0xff]  ;;  %v435_v17 = vld [vmem:[#allocation5 + $0x8] sm:$0xff]  }
  0x21   :  { %v83_v14 = vpack.c.bf16 %v82_v13, %v82_v13  ;;  %v436_v18 = vld [vmem:[#allocation5] sm:$0xff]   ;;  %v339_v19 = vld [vmem:[%s537_s2] ss:$0 sm:$0xff] }
  0x22   :  { %378 = vmatpush3.bf16.msra.mxu0 %v422_v2  ;;  %398 = vmatpush3.bf16.msra.mxu1 %v430_v6  ;;  %v348_v28 = vld [vmem:[%s539_s4] ss:$0 sm:$0xff] }
  0x23   :  { %379 = vmatprep.subr.bf16.mxu0 %v485_v0  ;;  %399 = vmatprep.subr.bf16.mxu1 %v485_v0 }
  0x26   :  { %380 = vmatpush3.bf16.msra.mxu0 %v423_v3  ;;  %400 = vmatpush3.bf16.msra.mxu1 %v431_v8 }
  0x27   :  { %381 = vmatprep.subr.bf16.mxu0 %v485_v0  ;;  %401 = vmatprep.subr.bf16.mxu1 %v485_v0 }
  0x2a   :  { %382 = vmatpush3.bf16.msra.mxu0 %v424_v5  ;;  %402 = vmatpush3.bf16.msra.mxu1 %v432_v10 }
  0x2b   :  { %383 = vmatprep.subr.bf16.mxu0 %v485_v0  ;;  %403 = vmatprep.subr.bf16.mxu1 %v485_v0 }
  0x2e   :  { %384 = vmatpush3.bf16.msra.mxu0 %v425_v7  ;;  %404 = vmatpush3.bf16.msra.mxu1 %v433_v15 }
  0x2f   :  { %385 = vmatprep.subr.bf16.mxu0 %v485_v0  ;;  %405 = vmatprep.subr.bf16.mxu1 %v485_v0 }
  0x32   :  { %386 = vmatpush3.bf16.msra.mxu0 %v426_v9  ;;  %406 = vmatpush3.bf16.msra.mxu1 %v434_v16 }
  0x33   :  { %387 = vmatprep.subr.bf16.mxu0 %v485_v0  ;;  %407 = vmatprep.subr.bf16.mxu1 %v485_v0 }
  0x36   :  { %388 = vmatpush3.bf16.msra.mxu0 %v427_v11  ;;  %408 = vmatpush3.bf16.msra.mxu1 %v435_v17 }
  0x37   :  { %389 = vmatprep.subr.bf16.mxu0 %v485_v0  ;;  %409 = vmatprep.subr.bf16.mxu1 %v485_v0 }
  0x3a   :  { %390 = vmatpush3.bf16.msra.mxu0 %v428_v12  ;;  %410 = vmatpush3.bf16.msra.mxu1 %v436_v18 }
  0x3d   :  { %392 = vmatmul.mubr.bf16.vlgmr.msra.gmra.mxu0 %v83_v14 }
  0xfd   :  { %v189_v20 = vpop.f32.mrf.mxu0 }
  0xfe   :  { %v190_v21 = vadd.f32 %v339_v19, %v189_v20 }
  0xff   :  { %v393_v22 = vpop.f32.mrf.mxu0 }
 0x100   :  { %v195_v23 = vmax.f32 %v190_v21, 0.0 }
 0x101   :  { %v192_v24 = vpop.f32.mrf.mxu0 }
 0x102   :  { %v196_v25 = vpack.c.bf16 %v195_v23, %v195_v23 }
 0x103   :  { %v394_v26 = vpop.f32.mrf.mxu0 }
 0x104   :  { %197 = vst [vmem:[#allocation2] sm:$0xf] %v196_v25 }
 0x10b   :  { %v198_v27 = vld [vmem:[#allocation2] sm:$0xf] }
 0x10c   :  { %412 = vmatmul.mubr.bf16.vlgmr.msra.gmra.mxu1 %v198_v27 }
 0x1cc   :  { %v304_v29 = vpop.f32.mrf.mxu1 }
 0x1cd   :  { %v305_v30 = vadd.f32 %v348_v28, %v304_v29 }
 0x1ce   :  { %v413_v31 = vpop.f32.mrf.mxu1 }
 0x1cf   :  { %310 = vst [vmem:[%s540_s5] sm:$0xff] %v305_v30 }
 0x1d0   :  { %v307_v32 = vpop.f32.mrf.mxu1 }
 0x1d2   :  { %v414_v33 = vpop.f32.mrf.mxu1 }
 0x1d3   :  { %326 = vsyncpa [#allocation4], 1 }
 0x1d4   :  { %327 = vsyncpa [#allocation6], 1 }

</bundles_post_ra>
